<compile_context>
chip_gen: v7x
topology: tpu7x:2x2x1
jax: 0.10.0
libtpu: 0.0.40
codegen_flags: <defaults>
</compile_context>

<pallas_src>
import functools

import jax
import jax.numpy as jnp
import numpy as np
from jax import lax
from jax.experimental import pallas as pl
from jax.experimental.pallas import tpu as pltpu
from jax.scipy.special import erf as jax_erf

EPS = 1e-5
NEG_BIG = -1e30


def _erf_approx(z):
    # Abramowitz & Stegun 7.1.26 rational approximation (max abs err ~1.5e-7)
    a1, a2, a3, a4, a5 = 0.254829592, -0.284496736, 1.421413741, -1.453152027, 1.061405429
    p = 0.3275911
    sgn = jnp.where(z >= 0.0, 1.0, -1.0)
    az = jnp.abs(z)
    t = 1.0 / (1.0 + p * az)
    poly = ((((a5 * t + a4) * t + a3) * t + a2) * t + a1) * t
    return sgn * (1.0 - poly * jnp.exp(-az * az))


def _gelu_exact(x):
    return 0.5 * x * (1.0 + _erf_approx(x * (1.0 / np.sqrt(2.0))))


def _layernorm(v, g, s):
    # Module semantics: (x - mean) / (std + eps), std with unbiased=False
    # (the custom LayerNorm of the spec, NOT torch.nn.LayerNorm).
    mean = jnp.mean(v, axis=-1, keepdims=True)
    std = jnp.sqrt(jnp.mean((v - mean) ** 2, axis=-1, keepdims=True))
    return g * ((v - mean) / (std + EPS)) + s


# ---------------------------------------------------------------------------
# Kernel A: LayerNorm1 + Q/K/V projection (once per row, lane-dense matmuls).
# ---------------------------------------------------------------------------
def ln_qkv_kernel(x_ref, g1_ref, s1_ref,
                  wq_ref, bq_ref, wk_ref, bk_ref, wv_ref, bv_ref,
                  qo_ref, ko_ref, vo_ref, *, scale):
    f32, bf16 = jnp.float32, jnp.bfloat16
    x = x_ref[0]                                         # (tr, D) f32
    xn = _layernorm(x, g1_ref[...], s1_ref[...])         # f32 statistics
    xb = xn.astype(bf16)
    q = jnp.dot(xb, wq_ref[...], preferred_element_type=f32) + bq_ref[...]
    k = jnp.dot(xb, wk_ref[...], preferred_element_type=f32) + bk_ref[...]
    v = jnp.dot(xb, wv_ref[...], preferred_element_type=f32) + bv_ref[...]
    qo_ref[0] = (q * scale).astype(qo_ref.dtype)         # pre-scaled queries (bf16)
    ko_ref[0] = k.astype(ko_ref.dtype)                   # bf16 right after bias add
    vo_ref[0] = v.astype(vo_ref.dtype)


# ---------------------------------------------------------------------------
# Kernel B: flash-style causal attention (online softmax over key tiles)
#           + fused out-projection, residual, LayerNorm2, FFN, residual.
# ---------------------------------------------------------------------------
def attn_ffn_kernel(x_ref, q_ref, k_ref, v_ref,
                    wo_ref, bo_ref, w1_ref, b1_ref, w2_ref, b2_ref,
                    g2_ref, s2_ref, out_ref,
                    m_sc, l_sc, acc_sc, *, q_tile, k_tile):
    f32, bf16 = jnp.float32, jnp.bfloat16
    tq, tk = q_tile, k_tile
    qi = pl.program_id(1)
    ki = pl.program_id(2)
    H = acc_sc.shape[0]

    q_start = pl.multiple_of(qi * tq, tq)
    k_start = pl.multiple_of(ki * tk, tk)

    @pl.when(ki == 0)
    def _init():
        m_sc[...] = jnp.full(m_sc.shape, -jnp.inf, f32)
        l_sc[...] = jnp.zeros(l_sc.shape, f32)
        acc_sc[...] = jnp.zeros(acc_sc.shape, f32)

    # Skip key blocks that are entirely in the future of this query tile.
    @pl.when(k_start <= q_start + (tq - 1))
    def _update():
        q = q_ref[0]                                     # (H, tq, hd) bf16 (pre-scaled)
        k = k_ref[0]                                     # (H, tk, hd) bf16
        s = jnp.einsum('hqd,hkd->hqk', q, k,
                       preferred_element_type=f32)       # (H, tq, tk) f32
        rows = lax.broadcasted_iota(jnp.int32, (tq, tk), 0) + q_start
        cols = lax.broadcasted_iota(jnp.int32, (tq, tk), 1) + k_start
        s = s + jnp.where(cols > rows, NEG_BIG, 0.0).astype(f32)[None, :, :]

        m_prev = m_sc[...]                               # (H, tq, 1)
        m_new = jnp.maximum(m_prev, jnp.max(s, axis=-1, keepdims=True))
        alpha = jnp.exp(m_prev - m_new)
        p = jnp.exp(s - m_new)                           # f32 softmax numerator
        l_sc[...] = alpha * l_sc[...] + jnp.sum(p, axis=-1, keepdims=True)
        acc_sc[...] = alpha * acc_sc[...] + jnp.einsum(
            'hqk,hkd->hqd', p.astype(bf16), v_ref[0], preferred_element_type=f32)
        m_sc[...] = m_new
        # TODO(synk): attention-weight dropout omitted (identity; eval / drop_rate=0)

    @pl.when(ki == pl.num_programs(2) - 1)
    def _finalize():
        # pl.reciprocal(approx=True): rows sum to 1 +/- ~1e-3 (intentional).
        inv_l = pl.reciprocal(l_sc[...], approx=True)    # (H, tq, 1)
        ctx = acc_sc[...] * inv_l                        # (H, tq, hd) f32
        # Concatenate heads into a lane-dense (tq, D) tile once per q tile,
        # then a single D-deep out-projection matmul (no per-head reduction).
        ctx2d = jnp.concatenate([ctx[h] for h in range(H)], axis=-1).astype(bf16)
        att = jnp.dot(ctx2d, wo_ref[...], preferred_element_type=f32) + bo_ref[...]

        x1 = x_ref[0] + att                              # drop_shortcut = identity

        xn2 = _layernorm(x1, g2_ref[...], s2_ref[...])
        hid = jnp.dot(xn2.astype(bf16), w1_ref[...],
                      preferred_element_type=f32) + b1_ref[...]
        hid = _gelu_exact(hid)
        ff = jnp.dot(hid.astype(bf16), w2_ref[...],
                     preferred_element_type=f32) + b2_ref[...]

        out_ref[0] = (x1 + ff).astype(out_ref.dtype)     # drop_shortcut = identity


def _pick_tile(total, preferred):
    for cand in (preferred, 512, 256, 128, 64, 32, 16, 8):
        if cand <= total and total % cand == 0 and cand % 8 == 0:
            return cand
    return total


def transformer_block(x, params, *, num_heads):
    (g1, s1, wq, bq, wk, bk, wv, bv, wo, bo, w1, b1, w2, b2, g2, s2) = params
    B, T, D = x.shape
    H = num_heads
    assert D % H == 0
    hd = D // H
    HID = w1.shape[1]
    scale = 1.0 / np.sqrt(hd)
    bf16, f32 = jnp.bfloat16, jnp.float32

    # Generation-aware sizing: 128-MiB VMEM parts (v5e/v6e) use bigger tiles
    # and a higher scoped-VMEM cap; 64-MiB parts (v7x) keep tq=128 / ~48 MiB.
    try:
        vmem_cap = int(pltpu.get_tpu_info().vmem_capacity_bytes)
    except Exception:
        vmem_cap = 128 * 1024 * 1024
    big_vmem = vmem_cap >= 100 * 1024 * 1024
    vmem_limit = int(min(vmem_cap * 3 // 4, 100 * 1024 * 1024))

    tr = _pick_tile(T, 512 if big_vmem else 256)      # row tile (kernel A)
    tq = _pick_tile(T, 256 if big_vmem else 128)      # query tile (kernel B)
    tk = tq                                           # key tile (== tq; index clamp assumes it)
    n_rt, n_qt, n_kt = T // tr, T // tq, T // tk

    # Cast parameters once; weights stay (in, out) so matmuls are lane-dense.
    wq_b, wk_b, wv_b, wo_b = (w.astype(bf16) for w in (wq, wk, wv, wo))
    w1_b, w2_b = w1.astype(bf16), w2.astype(bf16)
    g1_f, s1_f, g2_f, s2_f = (p.astype(f32) for p in (g1, s1, g2, s2))
    bq_f, bk_f, bv_f, bo_f = (p.astype(f32) for p in (bq, bk, bv, bo))
    b1_f, b2_f = b1.astype(f32), b2.astype(f32)
    # TODO(synk): for very large D on v7x, single-buffer / stream the FFN
    # weights (pl.Buffered(1) or an HID-tiled grid axis) instead of keeping
    # both fully resident with default double-buffering.

    def const_spec(a):
        nd = a.ndim
        return pl.BlockSpec(a.shape, lambda *args, _nd=nd: (0,) * _nd)

    # ---------------- Kernel A: LayerNorm1 + QKV projection ----------------
    qkv_cost = pl.CostEstimate(
        flops=int(6 * B * T * D * D),
        transcendentals=int(B * T),
        bytes_accessed=int(B * T * D * 4 + 3 * B * T * D * 2 + 3 * D * D * 2 + 8 * D * 4),
    )
    ln_qkv = pl.pallas_call(
        functools.partial(ln_qkv_kernel, scale=scale),
        out_shape=(jax.ShapeDtypeStruct((B, T, D), bf16),
                   jax.ShapeDtypeStruct((B, T, D), bf16),
                   jax.ShapeDtypeStruct((B, T, D), bf16)),
        grid=(B, n_rt),
        in_specs=[pl.BlockSpec((1, tr, D), lambda b, r: (b, r, 0))]
        + [const_spec(p) for p in (g1_f, s1_f, wq_b, bq_f, wk_b, bk_f, wv_b, bv_f)],
        out_specs=[pl.BlockSpec((1, tr, D), lambda b, r: (b, r, 0))] * 3,
        compiler_params=pltpu.CompilerParams(
            dimension_semantics=("parallel", "parallel"),
            vmem_limit_bytes=vmem_limit,
        ),
        cost_estimate=qkv_cost,
    )
    q_btd, k_btd, v_btd = ln_qkv(x, g1_f, s1_f, wq_b, bq_f, wk_b, bk_f, wv_b, bv_f)

    # Layout plumbing in XLA (sanctioned): (B, T, D) -> (B, H, T, hd).
    def to_heads(a):
        return a.reshape(B, T, H, hd).transpose(0, 2, 1, 3)

    q_h, k_h, v_h = to_heads(q_btd), to_heads(k_btd), to_heads(v_btd)

    # --------------- Kernel B: flash attention + out-proj + FFN -------------
    def kv_index_map(b, qi, ki):
        # Future (fully-masked) key blocks are skipped in the kernel; clamping
        # the block index keeps it unchanged so their K/V DMA is elided.
        return (b, 0, jnp.minimum(ki, qi), 0)

    attn_cost = pl.CostEstimate(
        flops=int(4 * B * T * T * D + 2 * B * T * D * D + 4 * B * T * D * HID),
        transcendentals=int(B * H * T * T + B * T * HID),
        bytes_accessed=int(
            2 * B * T * D * 4                                   # x in + out (f32)
            + B * T * D * 2                                     # Q (bf16)
            + 2 * B * T * D * 2 * max(1, (n_qt + 1) // 2)       # K/V (causal ~half refetch)
            + (D * D + 2 * D * HID) * 2                         # bf16 weights
            + 4 * (4 * D + HID)                                 # biases / norm params
        ),
    )
    attn_ffn = pl.pallas_call(
        functools.partial(attn_ffn_kernel, q_tile=tq, k_tile=tk),
        out_shape=jax.ShapeDtypeStruct((B, T, D), x.dtype),
        grid=(B, n_qt, n_kt),
        in_specs=[
            pl.BlockSpec((1, tq, D), lambda b, qi, ki: (b, qi, 0)),         # x (residual)
            pl.BlockSpec((1, H, tq, hd), lambda b, qi, ki: (b, 0, qi, 0)),  # Q
            pl.BlockSpec((1, H, tk, hd), kv_index_map),                     # K
            pl.BlockSpec((1, H, tk, hd), kv_index_map),                     # V
        ]
        + [const_spec(p) for p in (wo_b, bo_f, w1_b, b1_f, w2_b, b2_f, g2_f, s2_f)],
        out_specs=pl.BlockSpec((1, tq, D), lambda b, qi, ki: (b, qi, 0)),
        scratch_shapes=[
            pltpu.VMEM((H, tq, 1), f32),     # running max
            pltpu.VMEM((H, tq, 1), f32),     # running sum
            pltpu.VMEM((H, tq, hd), f32),    # output accumulator
        ],
        compiler_params=pltpu.CompilerParams(
            # Batch on the megacore split; q/k tiles are sequential per core.
            dimension_semantics=("parallel", "arbitrary", "arbitrary"),
            vmem_limit_bytes=vmem_limit,
        ),
        cost_estimate=attn_cost,
    )
    return attn_ffn(x, q_h, k_h, v_h, wo_b, bo_f, w1_b, b1_f, w2_b, b2_f, g2_f, s2_f)


def reference(x, params, *, num_heads):
    (g1, s1, wq, bq, wk, bk, wv, bv, wo, bo, w1, b1, w2, b2, g2, s2) = params
    B, T, D = x.shape
    hd = D // num_heads

    def ln(v, g, s):
        m = v.mean(-1, keepdims=True)
        std = jnp.sqrt(((v - m) ** 2).mean(-1, keepdims=True))
        return g * ((v - m) / (std + EPS)) + s

    xn = ln(x, g1, s1)
    q = (xn @ wq + bq).reshape(B, T, num_heads, hd).transpose(0, 2, 1, 3)
    k = (xn @ wk + bk).reshape(B, T, num_heads, hd).transpose(0, 2, 1, 3)
    v = (xn @ wv + bv).reshape(B, T, num_heads, hd).transpose(0, 2, 1, 3)
    scores = jnp.einsum("bhqd,bhkd->bhqk", q, k) / np.sqrt(hd)
    mask = jnp.triu(jnp.ones((T, T), bool), 1)
    scores = jnp.where(mask, -jnp.inf, scores)
    attn = jax.nn.softmax(scores, axis=-1)
    ctx = jnp.einsum("bhqk,bhkd->bhqd", attn, v).transpose(0, 2, 1, 3).reshape(B, T, D)
    x1 = x + (ctx @ wo + bo)
    xn2 = ln(x1, g2, s2)
    h = xn2 @ w1 + b1
    h = 0.5 * h * (1.0 + jax_erf(h / np.sqrt(2.0)))
    return x1 + (h @ w2 + b2)


if __name__ == "__main__":
    B, T, D, H = 2, 8, 32, 4          # batch, context_length, emb_dim, n_heads
    HID = 4 * D
    key = jax.random.PRNGKey(0)
    ks = jax.random.split(key, 16)

    def w(k, shape, scale=0.05):
        return (scale * jax.random.normal(k, shape)).astype(jnp.float32)

    params = [
        jnp.ones((1, D), jnp.float32),            # norm1.scale
        jnp.zeros((1, D), jnp.float32),           # norm1.shift
        w(ks[0], (D, D)), w(ks[1], (1, D)),       # W_query, b_query  (qkv_bias=True)
        w(ks[2], (D, D)), w(ks[3], (1, D)),       # W_key,   b_key
        w(ks[4], (D, D)), w(ks[5], (1, D)),       # W_value, b_value
        w(ks[6], (D, D)), w(ks[7], (1, D)),       # out_proj
        w(ks[8], (D, HID)), w(ks[9], (1, HID)),   # ff.Linear(emb, 4*emb)
        w(ks[10], (HID, D)), w(ks[11], (1, D)),   # ff.Linear(4*emb, emb)
        jnp.ones((1, D), jnp.float32),            # norm2.scale
        jnp.zeros((1, D), jnp.float32),           # norm2.shift
    ]
    x = jax.random.normal(ks[12], (B, T, D), jnp.float32)

    out = jax.block_until_ready(transformer_block(x, params, num_heads=H))
    ref = reference(x, params, num_heads=H)

    assert out.shape == (B, T, D)
    # bf16 MXU operands (f32 accumulation) => relax tolerance vs f32 reference.
    np.testing.assert_allclose(np.asarray(out), np.asarray(ref), rtol=2e-2, atol=2e-2)
    print("KERNEL_OK")
</pallas_src>

<mosaic_0001>
module attributes {stable_mosaic.version = 11 : i64} {
  func.func @ln_qkv_kernel(%arg0: i32, %arg1: i32, %arg2: memref<1x8x32xf32, #tpu.memory_space<vmem>>, %arg3: memref<1x32xf32, #tpu.memory_space<vmem>>, %arg4: memref<1x32xf32, #tpu.memory_space<vmem>>, %arg5: memref<32x32xbf16, #tpu.memory_space<vmem>>, %arg6: memref<1x32xf32, #tpu.memory_space<vmem>>, %arg7: memref<32x32xbf16, #tpu.memory_space<vmem>>, %arg8: memref<1x32xf32, #tpu.memory_space<vmem>>, %arg9: memref<32x32xbf16, #tpu.memory_space<vmem>>, %arg10: memref<1x32xf32, #tpu.memory_space<vmem>>, %arg11: memref<1x8x32xbf16, #tpu.memory_space<vmem>>, %arg12: memref<1x8x32xbf16, #tpu.memory_space<vmem>>, %arg13: memref<1x8x32xbf16, #tpu.memory_space<vmem>>) attributes {dimension_semantics = [#tpu.dimension_semantics<parallel>, #tpu.dimension_semantics<parallel>], iteration_bounds = array<i64: 2, 1>, scalar_prefetch = 0 : i64, scratch_operands = 0 : i64, tpu.core_type = #tpu.core_type<tc>, window_params = [{transform_indices = @transform_0, window_bounds = array<i64: 1, 8, 32>}, {pipeline_mode = #tpu.pipeline_mode<synchronous>, transform_indices = @transform_1, window_bounds = array<i64: 1, 32>}, {pipeline_mode = #tpu.pipeline_mode<synchronous>, transform_indices = @transform_2, window_bounds = array<i64: 1, 32>}, {pipeline_mode = #tpu.pipeline_mode<synchronous>, transform_indices = @transform_3, window_bounds = array<i64: 32, 32>}, {pipeline_mode = #tpu.pipeline_mode<synchronous>, transform_indices = @transform_4, window_bounds = array<i64: 1, 32>}, {pipeline_mode = #tpu.pipeline_mode<synchronous>, transform_indices = @transform_5, window_bounds = array<i64: 32, 32>}, {pipeline_mode = #tpu.pipeline_mode<synchronous>, transform_indices = @transform_6, window_bounds = array<i64: 1, 32>}, {pipeline_mode = #tpu.pipeline_mode<synchronous>, transform_indices = @transform_7, window_bounds = array<i64: 32, 32>}, {pipeline_mode = #tpu.pipeline_mode<synchronous>, transform_indices = @transform_8, window_bounds = array<i64: 1, 32>}, {transform_indices = @transform_9, window_bounds = array<i64: 1, 8, 32>}, {transform_indices = @transform_10, window_bounds = array<i64: 1, 8, 32>}, {transform_indices = @transform_11, window_bounds = array<i64: 1, 8, 32>}]} {
    %c0 = arith.constant 0 : index
    %c0_0 = arith.constant 0 : index
    %c0_1 = arith.constant 0 : index
    %0 = vector.load %arg2[%c0, %c0_0, %c0_1] : memref<1x8x32xf32, #tpu.memory_space<vmem>>, vector<1x8x32xf32>
    %1 = vector.shape_cast %0 : vector<1x8x32xf32> to vector<8x32xf32>
    %c0_2 = arith.constant 0 : index
    %c0_3 = arith.constant 0 : index
    %2 = vector.load %arg3[%c0_2, %c0_3] : memref<1x32xf32, #tpu.memory_space<vmem>>, vector<1x32xf32>
    %c0_4 = arith.constant 0 : index
    %c0_5 = arith.constant 0 : index
    %3 = vector.load %arg4[%c0_4, %c0_5] : memref<1x32xf32, #tpu.memory_space<vmem>>, vector<1x32xf32>
    %cst = arith.constant dense<0.000000e+00> : vector<8xf32>
    %4 = vector.multi_reduction <add>, %1, %cst [1] : vector<8x32xf32> to vector<8xf32>
    %5 = vector.shape_cast %4 : vector<8xf32> to vector<8x1xf32>
    %cst_6 = arith.constant 3.200000e+01 : f32
    %6 = vector.broadcast %cst_6 : f32 to vector<8x1xf32>
    %7 = arith.divf %5, %6 : vector<8x1xf32>
    %8 = vector.broadcast %7 : vector<8x1xf32> to vector<8x32xf32>
    %9 = arith.subf %1, %8 : vector<8x32xf32>
    %10 = arith.mulf %9, %9 : vector<8x32xf32>
    %cst_7 = arith.constant dense<0.000000e+00> : vector<8xf32>
    %11 = vector.multi_reduction <add>, %10, %cst_7 [1] : vector<8x32xf32> to vector<8xf32>
    %12 = vector.shape_cast %11 : vector<8xf32> to vector<8x1xf32>
    %cst_8 = arith.constant 3.200000e+01 : f32
    %13 = vector.broadcast %cst_8 : f32 to vector<8x1xf32>
    %14 = arith.divf %12, %13 : vector<8x1xf32>
    %15 = math.sqrt %14 : vector<8x1xf32>
    %16 = vector.broadcast %7 : vector<8x1xf32> to vector<8x32xf32>
    %17 = arith.subf %1, %16 : vector<8x32xf32>
    %cst_9 = arith.constant 9.99999974E-6 : f32
    %18 = vector.broadcast %cst_9 : f32 to vector<8x1xf32>
    %19 = arith.addf %15, %18 : vector<8x1xf32>
    %20 = vector.broadcast %19 : vector<8x1xf32> to vector<8x32xf32>
    %21 = arith.divf %17, %20 : vector<8x32xf32>
    %22 = vector.broadcast %2 : vector<1x32xf32> to vector<8x32xf32>
    %23 = arith.mulf %22, %21 : vector<8x32xf32>
    %24 = vector.broadcast %3 : vector<1x32xf32> to vector<8x32xf32>
    %25 = arith.addf %23, %24 : vector<8x32xf32>
    %26 = arith.truncf %25 : vector<8x32xf32> to vector<8x32xbf16>
    %c0_10 = arith.constant 0 : index
    %c0_11 = arith.constant 0 : index
    %27 = vector.load %arg5[%c0_10, %c0_11] : memref<32x32xbf16, #tpu.memory_space<vmem>>, vector<32x32xbf16>
    %cst_12 = arith.constant dense<0.000000e+00> : vector<8x32xf32>
    %28 = tpu.matmul %26, %27, %cst_12 {dimension_numbers = #tpu.dot_dimension_numbers<[1], [0], [0], [1], [0, 0, 1, 1], [], []>} : vector<8x32xbf16>, vector<32x32xbf16>, vector<8x32xf32> -> vector<8x32xf32>
    %c0_13 = arith.constant 0 : index
    %c0_14 = arith.constant 0 : index
    %29 = vector.load %arg6[%c0_13, %c0_14] : memref<1x32xf32, #tpu.memory_space<vmem>>, vector<1x32xf32>
    %30 = vector.broadcast %29 : vector<1x32xf32> to vector<8x32xf32>
    %31 = arith.addf %28, %30 : vector<8x32xf32>
    %c0_15 = arith.constant 0 : index
    %c0_16 = arith.constant 0 : index
    %32 = vector.load %arg7[%c0_15, %c0_16] : memref<32x32xbf16, #tpu.memory_space<vmem>>, vector<32x32xbf16>
    %cst_17 = arith.constant dense<0.000000e+00> : vector<8x32xf32>
    %33 = tpu.matmul %26, %32, %cst_17 {dimension_numbers = #tpu.dot_dimension_numbers<[1], [0], [0], [1], [0, 0, 1, 1], [], []>} : vector<8x32xbf16>, vector<32x32xbf16>, vector<8x32xf32> -> vector<8x32xf32>
    %c0_18 = arith.constant 0 : index
    %c0_19 = arith.constant 0 : index
    %34 = vector.load %arg8[%c0_18, %c0_19] : memref<1x32xf32, #tpu.memory_space<vmem>>, vector<1x32xf32>
    %35 = vector.broadcast %34 : vector<1x32xf32> to vector<8x32xf32>
    %36 = arith.addf %33, %35 : vector<8x32xf32>
    %c0_20 = arith.constant 0 : index
    %c0_21 = arith.constant 0 : index
    %37 = vector.load %arg9[%c0_20, %c0_21] : memref<32x32xbf16, #tpu.memory_space<vmem>>, vector<32x32xbf16>
    %cst_22 = arith.constant dense<0.000000e+00> : vector<8x32xf32>
    %38 = tpu.matmul %26, %37, %cst_22 {dimension_numbers = #tpu.dot_dimension_numbers<[1], [0], [0], [1], [0, 0, 1, 1], [], []>} : vector<8x32xbf16>, vector<32x32xbf16>, vector<8x32xf32> -> vector<8x32xf32>
    %c0_23 = arith.constant 0 : index
    %c0_24 = arith.constant 0 : index
    %39 = vector.load %arg10[%c0_23, %c0_24] : memref<1x32xf32, #tpu.memory_space<vmem>>, vector<1x32xf32>
    %40 = vector.broadcast %39 : vector<1x32xf32> to vector<8x32xf32>
    %41 = arith.addf %38, %40 : vector<8x32xf32>
    %cst_25 = arith.constant 0.353553385 : f32
    %42 = vector.broadcast %cst_25 : f32 to vector<8x32xf32>
    %43 = arith.mulf %31, %42 : vector<8x32xf32>
    %44 = arith.truncf %43 : vector<8x32xf32> to vector<8x32xbf16>
    %c0_26 = arith.constant 0 : index
    %c0_27 = arith.constant 0 : index
    %c0_28 = arith.constant 0 : index
    %45 = vector.load %arg11[%c0_26, %c0_27, %c0_28] : memref<1x8x32xbf16, #tpu.memory_space<vmem>>, vector<1x8x32xbf16>
    %46 = vector.shape_cast %45 : vector<1x8x32xbf16> to vector<8x32xbf16>
    %47 = vector.shape_cast %44 : vector<8x32xbf16> to vector<1x8x32xbf16>
    tpu.vector_store %arg11[%c0_26, %c0_27, %c0_28], %47 {strides = array<i32>} : memref<1x8x32xbf16, #tpu.memory_space<vmem>>, vector<1x8x32xbf16>,
    %48 = arith.truncf %36 : vector<8x32xf32> to vector<8x32xbf16>
    %c0_29 = arith.constant 0 : index
    %c0_30 = arith.constant 0 : index
    %c0_31 = arith.constant 0 : index
    %49 = vector.load %arg12[%c0_29, %c0_30, %c0_31] : memref<1x8x32xbf16, #tpu.memory_space<vmem>>, vector<1x8x32xbf16>
    %50 = vector.shape_cast %49 : vector<1x8x32xbf16> to vector<8x32xbf16>
    %51 = vector.shape_cast %48 : vector<8x32xbf16> to vector<1x8x32xbf16>
    tpu.vector_store %arg12[%c0_29, %c0_30, %c0_31], %51 {strides = array<i32>} : memref<1x8x32xbf16, #tpu.memory_space<vmem>>, vector<1x8x32xbf16>,
    %52 = arith.truncf %41 : vector<8x32xf32> to vector<8x32xbf16>
    %c0_32 = arith.constant 0 : index
    %c0_33 = arith.constant 0 : index
    %c0_34 = arith.constant 0 : index
    %53 = vector.load %arg13[%c0_32, %c0_33, %c0_34] : memref<1x8x32xbf16, #tpu.memory_space<vmem>>, vector<1x8x32xbf16>
    %54 = vector.shape_cast %53 : vector<1x8x32xbf16> to vector<8x32xbf16>
    %55 = vector.shape_cast %52 : vector<8x32xbf16> to vector<1x8x32xbf16>
    tpu.vector_store %arg13[%c0_32, %c0_33, %c0_34], %55 {strides = array<i32>} : memref<1x8x32xbf16, #tpu.memory_space<vmem>>, vector<1x8x32xbf16>,
    return
  }
  func.func @transform_0(%arg0: i32, %arg1: i32) -> (i32, i32, i32) {
    %c0_i32 = arith.constant 0 : i32
    %c0_i32_0 = arith.constant 0 : i32
    return %arg0, %arg1, %c0_i32 : i32, i32, i32
  }
  func.func @transform_1(%arg0: i32, %arg1: i32) -> (i32, i32) {
    %c0_i32 = arith.constant 0 : i32
    %c0_i32_0 = arith.constant 0 : i32
    %c0_i32_1 = arith.constant 0 : i32
    return %c0_i32, %c0_i32_0 : i32, i32
  }
  func.func @transform_2(%arg0: i32, %arg1: i32) -> (i32, i32) {
    %c0_i32 = arith.constant 0 : i32
    %c0_i32_0 = arith.constant 0 : i32
    %c0_i32_1 = arith.constant 0 : i32
    return %c0_i32, %c0_i32_0 : i32, i32
  }
  func.func @transform_3(%arg0: i32, %arg1: i32) -> (i32, i32) {
    %c0_i32 = arith.constant 0 : i32
    %c0_i32_0 = arith.constant 0 : i32
    %c0_i32_1 = arith.constant 0 : i32
    return %c0_i32, %c0_i32_0 : i32, i32
  }
  func.func @transform_4(%arg0: i32, %arg1: i32) -> (i32, i32) {
    %c0_i32 = arith.constant 0 : i32
    %c0_i32_0 = arith.constant 0 : i32
    %c0_i32_1 = arith.constant 0 : i32
    return %c0_i32, %c0_i32_0 : i32, i32
  }
  func.func @transform_5(%arg0: i32, %arg1: i32) -> (i32, i32) {
    %c0_i32 = arith.constant 0 : i32
    %c0_i32_0 = arith.constant 0 : i32
    %c0_i32_1 = arith.constant 0 : i32
    return %c0_i32, %c0_i32_0 : i32, i32
  }
  func.func @transform_6(%arg0: i32, %arg1: i32) -> (i32, i32) {
    %c0_i32 = arith.constant 0 : i32
    %c0_i32_0 = arith.constant 0 : i32
    %c0_i32_1 = arith.constant 0 : i32
    return %c0_i32, %c0_i32_0 : i32, i32
  }
  func.func @transform_7(%arg0: i32, %arg1: i32) -> (i32, i32) {
    %c0_i32 = arith.constant 0 : i32
    %c0_i32_0 = arith.constant 0 : i32
    %c0_i32_1 = arith.constant 0 : i32
    return %c0_i32, %c0_i32_0 : i32, i32
  }
  func.func @transform_8(%arg0: i32, %arg1: i32) -> (i32, i32) {
    %c0_i32 = arith.constant 0 : i32
    %c0_i32_0 = arith.constant 0 : i32
    %c0_i32_1 = arith.constant 0 : i32
    return %c0_i32, %c0_i32_0 : i32, i32
  }
  func.func @transform_9(%arg0: i32, %arg1: i32) -> (i32, i32, i32) {
    %c0_i32 = arith.constant 0 : i32
    %c0_i32_0 = arith.constant 0 : i32
    return %arg0, %arg1, %c0_i32 : i32, i32, i32
  }
  func.func @transform_10(%arg0: i32, %arg1: i32) -> (i32, i32, i32) {
    %c0_i32 = arith.constant 0 : i32
    %c0_i32_0 = arith.constant 0 : i32
    return %arg0, %arg1, %c0_i32 : i32, i32, i32
  }
  func.func @transform_11(%arg0: i32, %arg1: i32) -> (i32, i32, i32) {
    %c0_i32 = arith.constant 0 : i32
    %c0_i32_0 = arith.constant 0 : i32
    return %arg0, %arg1, %c0_i32 : i32, i32, i32
  }
}

</mosaic_0001>

<bundles_post_ra>
// kernel: tpu_custom_call.1
= control target key start
LH: loop header
LB: loop body
LE: loop exit
PB: predicated region body
PF: predicated region fallthrough
CT: control target
= control target key end

     0   :  { %s2264_s0 = inlined_call_operand.hbm [shape: f32[2,8,32], index: 0, kind: input, shape index: {}]   ;;  %s2265_s1 = inlined_call_operand.hbm [shape: f32[1,32], index: 1, kind: input, shape index: {}]   ;;  %s2266_s2 = inlined_call_operand.hbm [shape: f32[1,32], index: 2, kind: input, shape index: {}]   ;;  %s2267_s3 = inlined_call_operand.hbm [shape: bf16[32,32], index: 3, kind: input, shape index: {}]   ;;  %s2268_s4 = inlined_call_operand.hbm [shape: f32[1,32], index: 4, kind: input, shape index: {}]   ;;  %s2269_s5 = inlined_call_operand.hbm [shape: bf16[32,32], index: 5, kind: input, shape index: {}]   ;;  %s2270_s6 = inlined_call_operand.hbm [shape: f32[1,32], index: 6, kind: input, shape index: {}]   ;;  %s2271_s7 = inlined_call_operand.hbm [shape: bf16[32,32], index: 7, kind: input, shape index: {}]   ;;  %s2272_s8 = inlined_call_operand.hbm [shape: f32[1,32], index: 8, kind: input, shape index: {}]   ;;  %s2273_s9 = inlined_call_operand.hbm [shape: bf16[2,8,32], index: 9, kind: output, shape index: {0}]   ;;  %s2274_s10 = inlined_call_operand.hbm [shape: bf16[2,8,32], index: 10, kind: output, shape index: {1}]   ;;  %s2275_s11 = inlined_call_operand.hbm [shape: bf16[2,8,32], index: 11, kind: output, shape index: {2}]  }
   0x1   :  { %2284 = sst [smem:[#allocation29_spill]] %s2264_s0 }
   0x2   :  { %2285 = sst [smem:[#allocation30_spill]] %s2265_s1 }
   0x3   :  { %2286 = sst [smem:[#allocation31_spill]] %s2266_s2 }
   0x4   :  { %2287 = sst [smem:[#allocation32_spill]] %s2267_s3 }
   0x5   :  { %2288 = sst [smem:[#allocation33_spill]] %s2268_s4 }
   0x6   :  { %2289 = sst [smem:[#allocation34_spill]] %s2273_s9 }
   0x7   :  { %2290 = sst [smem:[#allocation35_spill]] %s2274_s10 }
   0x8   :  { %2291 = sst [smem:[#allocation36_spill]] %s2275_s11 }
   0x9   :  { %17 = vsyncpa [#allocation3], 0 }
   0xa   :  { %19 = vsyncpa [#allocation3 + $0x1], 0 }
   0xb   :  { %20 = vsyncpa [#allocation6], 0 }
   0xc   :  { %21 = vsyncpa [#allocation9], 0 }
   0xd   :  { %22 = vsyncpa [#allocation12], 0 }
   0xe   :  { %23 = vsyncpa [#allocation15], 0 }
   0xf   :  { %24 = vsyncpa [#allocation4], 0 }
  0x10   :  { %26 = vsyncpa [#allocation4 + $0x1], 0 }
  0x11   :  { %27 = vsyncpa [#allocation19], 0 }
  0x12   :  { %29 = vsyncpa [#allocation19 + $0x1], 0  ;;  %s1799_s17 = smov 0   ;;  %s1801_s18 = smov 0  }
  0x13   :  { %s1803_s19 = smov 0   ;;  %s1805_s20 = smov 0  }
  0x14   :  { %s1807_s21 = smov 0   ;;  %s1809_s22 = smov 0  }
  0x15 LB: > { %2292 = sst [smem:[#allocation28_spill]] %s1713_s20  ;;  %s1830_s23 = sadd.s32 4294967295, %s1721_s22   ;;  %s1721_s22 = sphi %s1809_s22, %s35_s22   ;;  %s1717_s21 = sphi %s1807_s21, %s2329_s21   ;;  %s1713_s20 = sphi %s1805_s20, %s2328_s20   ;;  %s1709_s19 = sphi %s1803_s19, %s2327_s19   ;;  %s1705_s18 = sphi %s1801_s18, %s2326_s18   ;;  %s1701_s17 = sphi %s1799_s17, %s2325_s17  }
  0x16   : > { %p1062_p0 = scmp.ge.s32.totalorder %s1721_s22, 1  ;;  %p2277_p1 = scmp.eq.s32.totalorder %s1830_s23, 0 }
  0x17   : > { %p332_p2 = scmp.lt.s32.totalorder %s1721_s22, 3  ;;  %s1723_s25 = smov [#allocation5]  }
  0x18   : > { %s345_s26 = sshll.u32 %s1723_s25, 4  ;;  %s1724_s27 = smov [#allocation8]   ;;  %s346_s26 = int_to_ptr.vmem [resolvable:$true] %s345_s26 }
  0x19   : > { %p1835_p3 = pnand %p1062_p0, %p332_p2  ;;  %s366_s28 = sshll.u32 %s1724_s27, 4  ;;  %s1848_s28 = int_to_ptr.vmem [resolvable:$true] %s366_s28 }
  0x1a   : > { %s1725_s30 = smov [#allocation11]   ;;  %s2295_s1 = sld [smem:[#allocation30_spill]] }
  0x1b   : > { %s2293_s24 = scalar_select %p1835_p3, 1, 0 }
  0x1c   : > { %p1182_p5 = pneg %p1835_p3  ;;  %s1850_s12 = sshll.u32 %s1725_s30, 4  ;;  %s391_s12 = int_to_ptr.vmem [resolvable:$true] %s1850_s12 }
  0x1e   : > { %p1844_p6 = pnand %p1182_p5, %p2277_p1 }
  0x20   : > { %s1309_s15 = scalar_lea.hbm %s2295_s1, 16  ;;  %p1860_p8 = pneg %p1844_p6 }
  0x21   : > { %p1310_p7 = scmp.ne.s32.totalorder %s2295_s1, %s1309_s15  ;;  %p1316_p11 = scmp.lt.u32.totalorder %s1309_s15, %s2295_s1 }
  0x23   : > { %p1312_p9 = pnand %p1860_p8, %p1310_p7 }
  0x25   : > { %p1313_p10 = pneg %p1312_p9 }
  0x27   : > { %p1318_p12 = pnand %p1316_p11, %p1313_p10 }
  0x29   : > { %1321 = shalt.err (!%p1318_p12)
}
  0x2a   : > { %s1322_s13 = scalar_lea.vmem %s346_s26, 16  ;;  %s1329_s14 = scalar_lea.vmem %s346_s26, 32 }
  0x2b   : > { %p1323_p13 = scmp.ne.s32.totalorder %s346_s26, %s1322_s13  ;;  %p1330_p5 = scmp.lt.s32.totalorder %s346_s26, %s346_s26 }
  0x2c   : > { %p1331_p4 = scmp.lt.s32.totalorder %s1329_s14, %s1322_s13 }
  0x2d   : > { %p1325_p0 = pnand %p1323_p13, %p1860_p8 }
  0x2e   : > { %p1332_p1 = por %p1331_p4, %p1330_p5 }
  0x2f   : > { %p1326_p2 = pneg %p1325_p0 }
  0x31   : > { %p1333_p3 = pnand %p1332_p1, %p1326_p2 }
  0x33   : > { %1336 = shalt.err (!%p1333_p3)
}
  0x34   : > { %1185 = dma.hbm_to_vmem [thread:$0]  (!%p1844_p6), %s2295_s1, 16, %s346_s26, [#allocation6]  }
  0x35   : > { %s2297_s3 = sld [smem:[#allocation32_spill]] }
  0x3b   : > { %s1337_s30 = scalar_lea.hbm %s2297_s3, 256 }
  0x3c   : > { %p1338_p7 = scmp.ne.s32.totalorder %s2297_s3, %s1337_s30  ;;  %p1344_p1 = scmp.lt.u32.totalorder %s1337_s30, %s2297_s3 }
  0x3e   : > { %p1340_p9 = pnand %p1338_p7, %p1860_p8 }
  0x40   : > { %p1341_p4 = pneg %p1340_p9 }
  0x42   : > { %p1346_p3 = pnand %p1344_p1, %p1341_p4 }
  0x44   : > { %1349 = shalt.err (!%p1346_p3)
}
  0x45   : > { %s1350_s26 = scalar_lea.vmem %s1848_s28, 256  ;;  %p1358_p13 = scmp.lt.s32.totalorder %s1848_s28, %s1848_s28 }
  0x46   : > { %p1351_p10 = scmp.ne.s32.totalorder %s1848_s28, %s1350_s26  ;;  %p1359_p0 = scmp.lt.s32.totalorder %s1350_s26, %s1350_s26 }
  0x48   : > { %p1353_p11 = pnand %p1351_p10, %p1860_p8  ;;  %p1360_p2 = por %p1359_p0, %p1358_p13 }
  0x4a   : > { %p1354_p12 = pneg %p1353_p11 }
  0x4c   : > { %p1361_p5 = pnand %p1360_p2, %p1354_p12 }
  0x4e   : > { %1364 = shalt.err (!%p1361_p5)
}
  0x4f   : > { %s1726_s9 = smov 64   ;;  %s1727_s10 = smov 4  }
  0x50   : > { %1191 = dma.hbm_to_vmem [thread:$0]  (!%p1844_p6), %s2297_s3, 256, %s1848_s28, [#allocation9], %s1726_s9, %s1726_s9, %s1727_s10  }
  0x51   : > { %s1365_s30 = scalar_lea.hbm %s2269_s5, 256 }
  0x52   : > { %p1366_p7 = scmp.ne.s32.totalorder %s2269_s5, %s1365_s30  ;;  %p1372_p1 = scmp.lt.u32.totalorder %s1365_s30, %s2269_s5 }
  0x54   : > { %p1368_p9 = pnand %p1366_p7, %p1860_p8 }
  0x56   : > { %p1369_p4 = pneg %p1368_p9 }
  0x58   : > { %p1374_p3 = pnand %p1372_p1, %p1369_p4 }
  0x5a   : > { %1377 = shalt.err (!%p1374_p3)
}
  0x5b   : > { %s1378_s16 = scalar_lea.vmem %s391_s12, 256  ;;  %p1386_p13 = scmp.lt.s32.totalorder %s391_s12, %s391_s12 }
  0x5c   : > { %p1379_p10 = scmp.ne.s32.totalorder %s391_s12, %s1378_s16  ;;  %p1387_p0 = scmp.lt.s32.totalorder %s1378_s16, %s1378_s16 }
  0x5e   : > { %p1381_p11 = pnand %p1379_p10, %p1860_p8  ;;  %p1388_p2 = por %p1387_p0, %p1386_p13 }
  0x60   : > { %p1382_p12 = pneg %p1381_p11 }
  0x62   : > { %p1389_p5 = pnand %p1388_p2, %p1382_p12 }
  0x64   : > { %1392 = shalt.err (!%p1389_p5)
}
  0x65   : > { %1197 = dma.hbm_to_vmem [thread:$0]  (!%p1844_p6), %s2269_s5, 256, %s391_s12, [#allocation12], %s1726_s9, %s1726_s9, %s1727_s10  }
  0x66   : > { %s1728_s25 = smov [#allocation14]   ;;  %s1729_s15 = smov [#allocation7]  }
  0x67   : > { %s414_s11 = sshll.u32 %s1728_s25, 4  ;;  %s356_s30 = sshll.u32 %s1729_s15, 4  ;;  %s415_s11 = int_to_ptr.vmem [resolvable:$true] %s414_s11  ;;  %s357_s30 = int_to_ptr.vmem [resolvable:$true] %s356_s30 }
  0x68   : > { %s1393_s26 = scalar_lea.hbm %s2271_s7, 256 }
  0x69   : > { %p1394_p7 = scmp.ne.s32.totalorder %s2271_s7, %s1393_s26  ;;  %p1400_p1 = scmp.lt.u32.totalorder %s1393_s26, %s2271_s7 }
  0x6b   : > { %p1396_p9 = pnand %p1394_p7, %p1860_p8 }
  0x6d   : > { %p1397_p4 = pneg %p1396_p9 }
  0x6f   : > { %p1402_p3 = pnand %p1400_p1, %p1397_p4 }
  0x71   : > { %1405 = shalt.err (!%p1402_p3)
}
  0x72   : > { %s1406_s12 = scalar_lea.vmem %s415_s11, 256  ;;  %p1414_p13 = scmp.lt.s32.totalorder %s415_s11, %s415_s11 }
  0x73   : > { %p1407_p10 = scmp.ne.s32.totalorder %s415_s11, %s1406_s12  ;;  %p1415_p0 = scmp.lt.s32.totalorder %s1406_s12, %s1406_s12 }
  0x75   : > { %p1409_p11 = pnand %p1407_p10, %p1860_p8  ;;  %p1416_p2 = por %p1415_p0, %p1414_p13 }
  0x77   : > { %p1410_p12 = pneg %p1409_p11 }
  0x79   : > { %p1417_p5 = pnand %p1416_p2, %p1410_p12 }
  0x7b   : > { %1420 = shalt.err (!%p1417_p5)
}
  0x7c   : > { %1203 = dma.hbm_to_vmem [thread:$0]  (!%p1844_p6), %s2271_s7, 256, %s415_s11, [#allocation15], %s1726_s9, %s1726_s9, %s1727_s10  }
  0x7d   : > { %s2298_s2 = sld [smem:[#allocation31_spill]] }
  0x83   : > { %s1421_s15 = scalar_lea.hbm %s2298_s2, 16 }
  0x84   : > { %p1422_p7 = scmp.ne.s32.totalorder %s2298_s2, %s1421_s15  ;;  %p1428_p1 = scmp.lt.u32.totalorder %s1421_s15, %s2298_s2 }
  0x86   : > { %p1424_p9 = pnand %p1422_p7, %p1860_p8 }
  0x88   : > { %p1425_p4 = pneg %p1424_p9 }
  0x8a   : > { %p1430_p3 = pnand %p1428_p1, %p1425_p4 }
  0x8c   : > { %1433 = shalt.err (!%p1430_p3)
}
  0x8d   : > { %s1434_s1 = scalar_lea.vmem %s357_s30, 16  ;;  %s1441_s9 = scalar_lea.vmem %s357_s30, 32 }
  0x8e   : > { %p1435_p10 = scmp.ne.s32.totalorder %s357_s30, %s1434_s1  ;;  %p1442_p13 = scmp.lt.s32.totalorder %s357_s30, %s357_s30 }
  0x8f   : > { %p1443_p0 = scmp.lt.s32.totalorder %s1441_s9, %s1434_s1 }
  0x90   : > { %p1437_p11 = pnand %p1435_p10, %p1860_p8 }
  0x91   : > { %p1444_p2 = por %p1443_p0, %p1442_p13 }
  0x92   : > { %p1438_p12 = pneg %p1437_p11 }
  0x94   : > { %p1445_p5 = pnand %p1444_p2, %p1438_p12 }
  0x96   : > { %1448 = shalt.err (!%p1445_p5)
}
  0x97   : > { %1188 = dma.hbm_to_vmem [thread:$0]  (!%p1844_p6), %s2298_s2, 16, %s357_s30, [#allocation6]  }
  0x98   : > { %s1730_s12 = smov [#allocation10]   ;;  %s1731_s20 = smov [#allocation13]  }
  0x99   : > { %s380_s3 = sshll.u32 %s1730_s12, 4  ;;  %s404_s28 = sshll.u32 %s1731_s20, 4  ;;  %s381_s3 = int_to_ptr.vmem [resolvable:$true] %s380_s3  ;;  %s405_s28 = int_to_ptr.vmem [resolvable:$true] %s404_s28 }
  0x9a   : > { %s2299_s4 = sld [smem:[#allocation33_spill]] }
  0xa0   : > { %s1449_s13 = scalar_lea.hbm %s2299_s4, 16 }
  0xa1   : > { %p1450_p7 = scmp.ne.s32.totalorder %s2299_s4, %s1449_s13  ;;  %p1456_p1 = scmp.lt.u32.totalorder %s1449_s13, %s2299_s4 }
  0xa3   : > { %p1452_p9 = pnand %p1450_p7, %p1860_p8 }
  0xa5   : > { %p1453_p4 = pneg %p1452_p9 }
  0xa7   : > { %p1458_p3 = pnand %p1456_p1, %p1453_p4 }
  0xa9   : > { %1461 = shalt.err (!%p1458_p3)
}
  0xaa   : > { %s1462_s30 = scalar_lea.vmem %s381_s3, 16  ;;  %s1469_s9 = scalar_lea.vmem %s381_s3, 32 }
  0xab   : > { %p1463_p10 = scmp.ne.s32.totalorder %s381_s3, %s1462_s30  ;;  %p1470_p13 = scmp.lt.s32.totalorder %s381_s3, %s381_s3 }
  0xac   : > { %p1471_p0 = scmp.lt.s32.totalorder %s1469_s9, %s1462_s30 }
  0xad   : > { %p1465_p11 = pnand %p1463_p10, %p1860_p8 }
  0xae   : > { %p1472_p2 = por %p1471_p0, %p1470_p13 }
  0xaf   : > { %p1466_p12 = pneg %p1465_p11 }
  0xb1   : > { %p1473_p5 = pnand %p1472_p2, %p1466_p12 }
  0xb3   : > { %1476 = shalt.err (!%p1473_p5)
}
  0xb4   : > { %1194 = dma.hbm_to_vmem [thread:$0]  (!%p1844_p6), %s2299_s4, 16, %s381_s3, [#allocation9]  }
  0xb5   : > { %s1477_s25 = scalar_lea.hbm %s2270_s6, 16 }
  0xb6   : > { %p1478_p7 = scmp.ne.s32.totalorder %s2270_s6, %s1477_s25  ;;  %p1484_p1 = scmp.lt.u32.totalorder %s1477_s25, %s2270_s6 }
  0xb8   : > { %p1480_p9 = pnand %p1478_p7, %p1860_p8 }
  0xba   : > { %p1481_p4 = pneg %p1480_p9 }
  0xbc   : > { %p1486_p3 = pnand %p1484_p1, %p1481_p4 }
  0xbe   : > { %1489 = shalt.err (!%p1486_p3)
}
  0xbf   : > { %s1490_s16 = scalar_lea.vmem %s405_s28, 16  ;;  %s1497_s3 = scalar_lea.vmem %s405_s28, 32 }
  0xc0   : > { %p1491_p10 = scmp.ne.s32.totalorder %s405_s28, %s1490_s16  ;;  %p1498_p13 = scmp.lt.s32.totalorder %s405_s28, %s405_s28 }
  0xc1   : > { %p1499_p0 = scmp.lt.s32.totalorder %s1497_s3, %s1490_s16 }
  0xc2   : > { %p1493_p11 = pnand %p1491_p10, %p1860_p8 }
  0xc3   : > { %p1500_p2 = por %p1499_p0, %p1498_p13 }
  0xc4   : > { %p1494_p12 = pneg %p1493_p11 }
  0xc6   : > { %p1501_p5 = pnand %p1500_p2, %p1494_p12 }
  0xc8   : > { %1504 = shalt.err (!%p1501_p5)
}
  0xc9   : > { %1200 = dma.hbm_to_vmem [thread:$0]  (!%p1844_p6), %s2270_s6, 16, %s405_s28, [#allocation12]  }
  0xca   : > { %s1732_s9 = smov [#allocation16]   ;;  %s1505_s20 = scalar_lea.hbm %s2272_s8, 16 }
  0xcb   : > { %s428_s10 = sshll.u32 %s1732_s9, 4  ;;  %p1506_p7 = scmp.ne.s32.totalorder %s2272_s8, %s1505_s20  ;;  %s429_s10 = int_to_ptr.vmem [resolvable:$true] %s428_s10 }
  0xcc   : > { %p1512_p1 = scmp.lt.u32.totalorder %s1505_s20, %s2272_s8 }
  0xcd   : > { %p1508_p9 = pnand %p1506_p7, %p1860_p8 }
  0xcf   : > { %p1509_p4 = pneg %p1508_p9 }
  0xd1   : > { %p1514_p3 = pnand %p1512_p1, %p1509_p4 }
  0xd3   : > { %1517 = shalt.err (!%p1514_p3)
}
  0xd4   : > { %s1518_s28 = scalar_lea.vmem %s429_s10, 16  ;;  %s1525_s26 = scalar_lea.vmem %s429_s10, 32 }
  0xd5   : > { %p1519_p10 = scmp.ne.s32.totalorder %s429_s10, %s1518_s28  ;;  %p1526_p13 = scmp.lt.s32.totalorder %s429_s10, %s429_s10 }
  0xd6   : > { %p1527_p0 = scmp.lt.s32.totalorder %s1525_s26, %s1518_s28 }
  0xd7   : > { %p1521_p11 = pnand %p1519_p10, %p1860_p8 }
  0xd8   : > { %p1528_p2 = por %p1527_p0, %p1526_p13 }
  0xd9   : > { %p1522_p12 = pneg %p1521_p11 }
  0xdb   : > { %p1529_p5 = pnand %p1528_p2, %p1522_p12 }
  0xdd   : > { %1532 = shalt.err (!%p1529_p5)
}
  0xde   : > { %1206 = dma.hbm_to_vmem [thread:$0]  (!%p1844_p6), %s2272_s8, 16, %s429_s10, [#allocation15]  }
  0xdf   : > { %s2281_s27 = sadd.s32 4294967294, %s1721_s22   ;;  %s47_s1 = sadd.s32 1, %s1717_s21 }
  0xe0   : > { %p49_p8 = scmp.ge.s32.totalorder %s47_s1, 2  ;;  %s56_s29 = sadd.s32 1, %s1709_s19 }
  0xe1   : > { %p63_p7 = scmp.ne.s32.totalorder %s1709_s19, %s1705_s18  ;;  %p64_p9 = scmp.eq.s32.totalorder %s1721_s22, 0 }
  0xe2   : > { %s2331_s1 = smov (%p49_p8, %s47_s1), 0  ;;  %p69_p1 = scmp.ne.s32.totalorder %s1705_s18, %s1701_s17 }
  0xe3   : > { %p2025_p4 = por %p64_p9, %p63_p7  ;;  %s51_s9 = ssub.s32 %s1717_s21, %s2331_s1 }
  0xe4   : > { %p263_p6 = scmp.eq.s32.totalorder %s1830_s23, 1  ;;  %p54_p3 = scmp.eq.s32.totalorder %s51_s9, 0 }
  0xe5   : > { %p2301_p10 = scmp.eq.s32.totalorder %s1830_s23, 0  ;;  %p269_p13 = scmp.eq.s32.totalorder %s2281_s27, 1 }
  0xe6   : > { %p2040_p12 = por %p263_p6, %p63_p7  ;;  %p1229_p2 = scmp.lt.s32.totalorder %s1721_s22, 2 }
  0xe7   : > { %p2036_p11 = por %p2301_p10, %p69_p1  ;;  %p2049_p0 = por %p269_p13, %p69_p1 }
  0xe8   : > { %s2303_s11 = scalar_select %p2040_p12, 1, 0 }
  0xe9   : > { %s2047_s12 = scalar_select %p54_p3, %s1709_s19, %s56_s29  }
  0xea   : > { %s2304_s20 = scalar_select %p2049_p0, 1, 0 }
  0xeb   : > { %s439_s25 = sand.u32 1, %s1709_s19   ;;  %s1073_s15 = sshll.u32 %s1717_s21, 7 }
  0xec   : > { %s1072_s13 = sshll.u32 %s439_s25, 3  ;;  %s2305_s0 = sld [smem:[#allocation29_spill]] }
  0xed   : > { %s443_s16 = scalar_lea.vmem [#allocation2], %s1072_s13  ;;  %p2063_p5 = pnand %p1229_p2, %p2025_p4 }
  0xee   : > { %s451_s3 = sshll.u32 %s443_s16, 4  ;;  %s440_s9 = scalar_lea.sflag [#allocation3], %s439_s25  ;;  %s2067_s3 = int_to_ptr.vmem [resolvable:$true] %s451_s3 }
  0xef   : > { %p1535_p7 = pneg %p2063_p5 }
  0xf2   : > { %s2059_s26 = scalar_lea.hbm %s2305_s0, %s1073_s15  ;;  %s1538_s30 = scalar_lea.hbm %s2305_s0, 256 }
  0xf3   : > { %s1533_s27 = scalar_lea.hbm %s2059_s26, 128  ;;  %p1539_p4 = scmp.lt.u32.totalorder %s2059_s26, %s2305_s0 }
  0xf4   : > { %p1534_p8 = scmp.ne.s32.totalorder %s2059_s26, %s1533_s27  ;;  %p1540_p6 = scmp.lt.u32.totalorder %s1538_s30, %s1533_s27 }
  0xf5   : > { %p1542_p10 = scmp.lt.u32.totalorder %s1533_s27, %s2059_s26 }
  0xf6   : > { %p1536_p9 = pnand %p1535_p7, %p1534_p8  ;;  %p1541_p3 = por %p1540_p6, %p1539_p4 }
  0xf8   : > { %p1537_p1 = pneg %p1536_p9  ;;  %p1543_p13 = por %p1542_p10, %p1541_p3 }
  0xfa   : > { %p1544_p2 = pnand %p1543_p13, %p1537_p1 }
  0xfc   : > { %1547 = shalt.err (!%p1544_p2)
}
  0xfd   : > { %s1548_s25 = scalar_lea.vmem %s2067_s3, 128  ;;  %s1733_s16 = smov [#allocation2]  }
  0xfe   : > { %p1549_p8 = scmp.ne.s32.totalorder %s2067_s3, %s1548_s25  ;;  %s1553_s15 = sshll.u32 %s1733_s16, 4  ;;  %s1554_s15 = int_to_ptr.vmem [resolvable:$false] %s1553_s15 }
  0xff   : > { %s1555_s13 = scalar_lea.vmem %s1554_s15, 256  ;;  %p1556_p12 = scmp.lt.s32.totalorder %s2067_s3, %s1554_s15 }
 0x100   : > { %p1551_p9 = pnand %p1549_p8, %p1535_p7  ;;  %p1557_p4 = scmp.lt.s32.totalorder %s1555_s13, %s1548_s25 }
 0x102   : > { %p1552_p0 = pneg %p1551_p9  ;;  %p1558_p6 = por %p1557_p4, %p1556_p12 }
 0x104   : > { %p1559_p3 = pnand %p1558_p6, %p1552_p0 }
 0x106   : > { %1562 = shalt.err (!%p1559_p3)
}
 0x107   : > { %1210 = dma.hbm_to_vmem [thread:$0]  (!%p2063_p5), %s2059_s26, 128, %s2067_s3, %s440_s9  }
 0x108   : > { %p2307_p1 = scmp.ne.s32.totalorder %s2293_s24, 0 }
 0x109   : > { %s2097_s27 = sand.u32 (!%p2307_p1), 1, %s1705_s18  }
 0x10a   : > { %460 = sbr.rel (%p2307_p1) target bundleno = 895 (0x37f), region = 56  ;;  %s1075_s30 = sshll.u32 (!%p2307_p1), %s2097_s27, 3 }
 0x10b   : > { %s463_s14 = scalar_lea.sflag (!%p2307_p1), [#allocation3], %s2097_s27  ;;  %s466_s28 = scalar_lea.vmem (!%p2307_p1), [#allocation2], %s1075_s30 }
 0x111   : > { %1672 = dma.done.wait (%p2036_p11), %s463_s14, 128  }
 0x112   : > { %1674 = vsyncadd (%p2036_p11), %s463_s14, 4294967168  ;;  %p2308_p12 = scmp.eq.s32.totalorder %s1830_s23, 0 }
 0x114   : > { %1676 = dma.done.wait (%p2308_p12), [#allocation6], 32   ;;  %p2309_p0 = pmov %p2308_p12 }
 0x116   : > { %1678 = vsyncadd (%p2309_p0), [#allocation6], 4294967264  ;;  %p2310_p5 = pmov %p2309_p0 }
 0x117   : > { %p2311_p7 = pmov %p2309_p0 }
 0x118   : > { %1680 = dma.done.wait (%p2310_p5), [#allocation9], 272  }
 0x119   : > { %1682 = vsyncadd (%p2311_p7), [#allocation9], 4294967024  ;;  %p2312_p10 = pmov %p2309_p0 }
 0x11a   : > { %p2313_p13 = pmov %p2309_p0 }
 0x11b   : > { %1684 = dma.done.wait (%p2312_p10), [#allocation12], 272  }
 0x11c   : > { %1686 = vsyncadd (%p2313_p13), [#allocation12], 4294967024  ;;  %p2314_p11 = pmov %p2309_p0 }
 0x11d   : > { %p2315_p2 = pmov %p2309_p0 }
 0x11e   : > { %1688 = dma.done.wait (%p2314_p11), [#allocation15], 272  }
 0x11f   : > { %1690 = vsyncadd (%p2315_p2), [#allocation15], 4294967024  ;;  %vm551_vm0 = vcmask 261120   ;;  %v548_v0 = vld [vmem:[%s466_s28] sm:$0xff]  ;;  %v1299_v7 = vld [vmem:[#allocation8] sm:$0xff]   ;;  %v1734_v9 = vmov 0.0  }
 0x120   : > { %v552_v1 = vsel %vm551_vm0, %v548_v0, 0.0  ;;  %v1300_v8 = vld [vmem:[#allocation11] sm:$0xff]   ;;  %1118 = vmatprep.subr.bf16.mxu0 %v1734_v9  ;;  %1126 = vmatprep.subr.bf16.mxu1 %v1734_v9  ;;  %v1301_v10 = vld [vmem:[#allocation8 + $0x8] sm:$0xff]   ;;  %v1302_v11 = vld [vmem:[#allocation11 + $0x8] sm:$0xff]   ;;  %vm1735_vm1 = vmmov 0   ;;  %s2316_s24 = sld [smem:[#allocation28_spill]] }
 0x121   : > { %553 = vadd.xlane.f32.xlu0 %v552_v1  ;;  %1119 = vmatpush3.bf16.msra.mxu0 %v1299_v7  ;;  %v1087_v21 = vld [vmem:[#allocation5] ss:$0 sm:$0xff]  ;;  %v1088_v23 = vld [vmem:[#allocation7] ss:$0 sm:$0xff]  ;;  %v1303_v26 = vld [vmem:[#allocation14] sm:$0xff]   ;;  %s2130_s10 = sshll.u32 %s2097_s27, 2 }
 0x122   : > { %1127 = vmatpush3.bf16.msra.mxu1 %v1300_v8  ;;  %1120 = vmatprep.subr.bf16.mxu0 %v1734_v9  ;;  %v1304_v28 = vld [vmem:[#allocation14 + $0x8] sm:$0xff]   ;;  %v1093_v30 = vld [vmem:[#allocation13] ss:$0 sm:$0xff]  ;;  %s793_s26 = sand.u32 1, %s1830_s23   ;;  %s539_s29 = scalar_lea.vmem [#allocation18], %s2130_s10  ;;  %vm782_vm4 = vcmask 257024  }
 0x123   : > { %1128 = vmatprep.subr.bf16.mxu1 %v1734_v9  ;;  %1122 = vmatprep.mubr.msk.bf16.mxu0 %vm1735_vm1, %v1734_v9  ;;  %v1089_v29 = vld [vmem:[#allocation10] ss:$0 sm:$0xff]  ;;  %s827_s9 = sshll.u32 %s539_s29, 4  ;;  %s2283_s25 = scalar_lea.vmem [#allocation17], %s2130_s10  ;;  %v1097_v44 = vld [vmem:[#allocation16] ss:$0 sm:$0xff]  ;;  %s2146_s9 = int_to_ptr.vmem [resolvable:$true] %s827_s9 }
 0x124   : > { %1130 = vmatprep.mubr.msk.bf16.mxu1 %vm1735_vm1, %v1734_v9  ;;  %s813_s16 = sshll.u32 %s2283_s25, 4  ;;  %s2317_s13 = sld [smem:[#allocation35_spill]]  ;;  %s2155_s16 = int_to_ptr.vmem [resolvable:$true] %s813_s16 }
 0x125   : > { %1121 = vmatpush3.bf16.msra.mxu0 %v1301_v10  ;;  %s2157_s0 = scalar_lea.sflag [#allocation19], %s793_s26  ;;  %s1563_s23 = scalar_lea.vmem %s2146_s9, 64 }
 0x126   : > { %1129 = vmatpush3.bf16.msra.mxu1 %v1302_v11  ;;  %1134 = vmatprep.subr.bf16.mxu0 %v1734_v9  ;;  %s2134_s3 = sshll.u32 %s2316_s24, 6  ;;  %s2318_s24 = sld [smem:[#allocation34_spill]] }
 0x127   : > { %p1564_p8 = scmp.ne.s32.totalorder %s2146_s9, %s1563_s23  ;;  %p2319_p9 = scmp.ne.s32.totalorder %s2303_s11, 0 }
 0x128   : > { %s1736_s15 = smov [#allocation18]  }
 0x129   : > { %p1565_p4 = pnand %p1564_p8, %p2319_p9  ;;  %s1567_s2 = sshll.u32 %s1736_s15, 4  ;;  %s1568_s2 = int_to_ptr.vmem [resolvable:$false] %s1567_s2 }
 0x12a   : > { %s2144_s30 = scalar_lea.hbm %s2317_s13, %s2134_s3  ;;  %s1569_s4 = scalar_lea.vmem %s1568_s2, 128 }
 0x12b   : > { %p1566_p6 = pneg %p1565_p4  ;;  %p1570_p3 = scmp.lt.s32.totalorder %s2146_s9, %s1568_s2 }
 0x12c   : > { %s2153_s25 = scalar_lea.hbm %s2318_s24, %s2134_s3  ;;  %p1571_p1 = scmp.lt.s32.totalorder %s1569_s4, %s1563_s23 }
 0x12e   : > { %p1572_p12 = por %p1571_p1, %p1570_p3 }
 0x130   : > { %p1573_p0 = pnand %p1572_p12, %p1566_p6 }
 0x1ae   : > { %v554_v2 = vpop.xlane.xlu0 %553 }
 0x1af   : > { %v556_v3 = vmul.f32 0.03125, %v554_v2 }
 0x1b1   : > { %v557_v4 = vsub.f32 %v548_v0, %v556_v3 }
 0x1b3   : > { %v558_v5 = vmul.f32 %v557_v4, %v557_v4 }
 0x1b5   : > { %v559_v6 = vsel %vm551_vm0, %v558_v5, 0.0 }
 0x1b6   : > { %560 = vadd.xlane.f32.xlu0 %v559_v6 }
 0x243   : > { %v561_v12 = vpop.xlane.xlu0 %560 }
 0x244   : > { %v562_v13 = vmul.f32 0.03125, %v561_v12 }
 0x246   : > { %1305 = vrsqrt.f32 %v562_v13  ;;  %vm565_vm2 = vcmp.eq.f32.partialorder %v562_v13, inf  ;;  %v568_v16 = vand.u32 2147483648, %v562_v13  ;;  %vm567_vm3 = vcmp.eq.f32.partialorder %v562_v13, 0.0 }
 0x250   : > { %v1306_v14 = vpop.eup %1305 }
 0x251   : > { %v564_v15 = vmul.f32 %v1306_v14, %v562_v13 }
 0x253   : > { %v566_v17 = vsel %vm565_vm2, %v562_v13, %v564_v15 }
 0x254   : > { %v569_v18 = vsel %vm567_vm3, %v568_v16, %v566_v17 }
 0x255   : > { %v570_v19 = vadd.f32 1e-05, %v569_v18 }
 0x257   : > { %1307 = vrcp.f32 %v570_v19 }
 0x261   : > { %v1308_v20 = vpop.eup %1307 }
 0x262   : > { %v572_v22 = vmul.f32 %v1308_v20, %v557_v4 }
 0x264   : > { %v579_v24 = vmul.f32 %v1087_v21, %v572_v22 }
 0x266   : > { %v586_v25 = vadd.f32 %v1088_v23, %v579_v24 }
 0x268   : > { %v587_v27 = vpack.c.bf16 %v586_v25, %v586_v25 }
 0x26a   : > { %1123 = vmatmul.mubr.msk.bf16.vlgmr.msra.gmra.mrb[0].mxu0 %vm551_vm0, %v587_v27  ;;  %1131 = vmatmul.mubr.msk.bf16.vlgmr.msra.gmra.mrb[0].mxu1 %vm551_vm0, %v587_v27 }
 0x26b   : > { %1135 = vmatpush3.bf16.msra.mxu0 %v1303_v26  ;;  %1138 = vmatprep.mubr.msk.bf16.mxu0 %vm1735_vm1, %v1734_v9 }
 0x26c   : > { %1136 = vmatprep.subr.bf16.mxu0 %v1734_v9 }
 0x26f   : > { %1137 = vmatpush3.bf16.msra.mxu0 %v1304_v28 }
 0x272   : > { %1139 = vmatmul.mubr.msk.bf16.vlgmr.msra.gmra.mrb[4].mxu0 %vm551_vm0, %v587_v27 }
 0x33d   : > { %v648_v31 = vpop.f32.mrb[0].mxu0  ;;  %v711_v32 = vpop.f32.mrb[0].mxu1 }
 0x33e   : > { %v649_v33 = vadd.f32 %v1089_v29, %v648_v31  ;;  %v712_v34 = vadd.f32 %v1093_v30, %v711_v32  ;;  %v1124_v35 = vpop.f32.mrb[1].mxu0  ;;  %v1132_v36 = vpop.f32.mrb[1].mxu1 }
 0x33f   : > { %v651_v37 = vpop.f32.mrb[2].mxu0  ;;  %v714_v38 = vpop.f32.mrb[2].mxu1 }
 0x340   : > { %v780_v39 = vmul.f32 0.35355338, %v649_v33  ;;  %v784_v40 = vpack.c.bf16 %v712_v34, %v712_v34  ;;  %v1125_v41 = vpop.f32.mrb[3].mxu0  ;;  %v1133_v42 = vpop.f32.mrb[3].mxu1 }
 0x342   : > { %v781_v43 = vpack.c.bf16 %v780_v39, %v780_v39  ;;  %785 = vst.msk [vmem:[%s539_s29] sm:$0xf] %vm782_vm4, %v784_v40 }
 0x343   : > { %1576 = shalt.err (!%p1573_p0)
}
 0x344   : > { %s1577_s26 = scalar_lea.hbm %s2144_s30, 64  ;;  %s1581_s28 = scalar_lea.hbm %s2317_s13, 128 }
 0x345   : > { %p1578_p5 = scmp.ne.s32.totalorder %s2144_s30, %s1577_s26  ;;  %p1582_p13 = scmp.lt.u32.totalorder %s2144_s30, %s2317_s13 }
 0x346   : > { %p1583_p11 = scmp.lt.u32.totalorder %s1581_s28, %s1577_s26  ;;  %p1585_p8 = scmp.lt.u32.totalorder %s1577_s26, %s2144_s30 }
 0x347   : > { %p1579_p7 = pnand %p1578_p5, %p2319_p9 }
 0x348   : > { %p1584_p2 = por %p1583_p11, %p1582_p13 }
 0x349   : > { %p1580_p10 = pneg %p1579_p7 }
 0x34a   : > { %p1586_p4 = por %p1585_p8, %p1584_p2 }
 0x34c   : > { %p1587_p6 = pnand %p1586_p4, %p1580_p10 }
 0x34e   : > { %1590 = shalt.err (!%p1587_p6)
}
 0x34f   : > { %1177 = dma.vmem_to_hbm [thread:$0]  (%p2319_p9), %s2146_s9, 64, %s2144_s30, %s2157_s0   ;;  %v774_v45 = vpop.f32.mrb[4].mxu0 }
 0x350   : > { %s2320_s4 = scalar_lea.vmem [#allocation17], %s2130_s10  ;;  %s546_s23 = scalar_lea.vmem [#allocation20], %s2130_s10 }
 0x351   : > { %783 = vst.msk [vmem:[%s2320_s4] sm:$0xf] %vm782_vm4, %v781_v43  ;;  %s2187_s26 = sshll.u32 %s546_s23, 4  ;;  %s789_s29 = scalar_lea.sflag [#allocation4], %s2097_s27  ;;  %s842_s26 = int_to_ptr.vmem [resolvable:$true] %s2187_s26 }
 0x352   : > { %s1591_s14 = scalar_lea.vmem %s2155_s16, 64  ;;  %s1737_s28 = smov [#allocation17]  }
 0x353   : > { %p1592_p3 = scmp.ne.s32.totalorder %s2155_s16, %s1591_s14  ;;  %s1595_s15 = sshll.u32 %s1737_s28, 4  ;;  %s1596_s15 = int_to_ptr.vmem [resolvable:$false] %s1595_s15 }
 0x354   : > { %s1597_s2 = scalar_lea.vmem %s1596_s15, 128  ;;  %p1598_p0 = scmp.lt.s32.totalorder %s2155_s16, %s1596_s15 }
 0x355   : > { %p1593_p1 = pnand %p1592_p3, %p2319_p9  ;;  %p1599_p5 = scmp.lt.s32.totalorder %s1597_s2, %s1591_s14 }
 0x357   : > { %p1594_p12 = pneg %p1593_p1  ;;  %p1600_p7 = por %p1599_p5, %p1598_p0 }
 0x359   : > { %p1601_p10 = pnand %p1600_p7, %p1594_p12 }
 0x35b   : > { %1604 = shalt.err (!%p1601_p10)
}
 0x35c   : > { %s1605_s27 = scalar_lea.hbm %s2153_s25, 64  ;;  %s1609_s4 = scalar_lea.hbm %s2318_s24, 128 }
 0x35d   : > { %p1606_p13 = scmp.ne.s32.totalorder %s2153_s25, %s1605_s27  ;;  %p1610_p8 = scmp.lt.u32.totalorder %s2153_s25, %s2318_s24 }
 0x35e   : > { %p1611_p4 = scmp.lt.u32.totalorder %s1609_s4, %s1605_s27  ;;  %p1613_p3 = scmp.lt.u32.totalorder %s1605_s27, %s2153_s25 }
 0x35f   : > { %p1607_p11 = pnand %p1606_p13, %p2319_p9 }
 0x360   : > { %p1612_p6 = por %p1611_p4, %p1610_p8 }
 0x361   : > { %p1608_p2 = pneg %p1607_p11 }
 0x362   : > { %p1614_p1 = por %p1613_p3, %p1612_p6 }
 0x364   : > { %p1615_p12 = pnand %p1614_p1, %p1608_p2 }
 0x366   : > { %1618 = shalt.err (!%p1615_p12)
}
 0x367   : > { %1176 = dma.vmem_to_hbm [thread:$0]  (%p2319_p9), %s2155_s16, 64, %s2153_s25, %s789_s29   ;;  %v775_v46 = vadd.f32 %v1097_v44, %v774_v45  ;;  %v1140_v47 = vpop.f32.mrb[5].mxu0 }
 0x368   : > { %v777_v48 = vpop.f32.mrb[6].mxu0  ;;  %s2321_s27 = sld [smem:[#allocation36_spill]]  ;;  %s1619_s30 = scalar_lea.vmem %s842_s26, 64 }
 0x369   : > { %v786_v49 = vpack.c.bf16 %v775_v46, %v775_v46  ;;  %v1141_v50 = vpop.f32.mrb[7].mxu0  ;;  %p1620_p0 = scmp.ne.s32.totalorder %s842_s26, %s1619_s30  ;;  %s1738_s25 = smov [#allocation20]  }
 0x36a   : > { %s1623_s16 = sshll.u32 %s1738_s25, 4  ;;  %s1624_s16 = int_to_ptr.vmem [resolvable:$false] %s1623_s16 }
 0x36b   : > { %787 = vst.msk [vmem:[%s546_s23] sm:$0xf] %vm782_vm4, %v786_v49  ;;  %p1621_p5 = pnand %p1620_p0, %p2319_p9  ;;  %s1625_s29 = scalar_lea.vmem %s1624_s16, 128 }
 0x36c   : > { %p1626_p10 = scmp.lt.s32.totalorder %s842_s26, %s1624_s16  ;;  %p1627_p13 = scmp.lt.s32.totalorder %s1625_s29, %s1619_s30 }
 0x36d   : > { %p1622_p7 = pneg %p1621_p5 }
 0x36e   : > { %s2215_s9 = scalar_lea.hbm %s2321_s27, %s2134_s3  ;;  %p1628_p11 = por %p1627_p13, %p1626_p10 }
 0x370   : > { %p1629_p2 = pnand %p1628_p11, %p1622_p7 }
 0x372   : > { %1632 = shalt.err (!%p1629_p2)
}
 0x373   : > { %s1633_s10 = scalar_lea.hbm %s2215_s9, 64  ;;  %s1637_s4 = scalar_lea.hbm %s2321_s27, 128 }
 0x374   : > { %p1634_p8 = scmp.ne.s32.totalorder %s2215_s9, %s1633_s10  ;;  %p1638_p3 = scmp.lt.u32.totalorder %s2215_s9, %s2321_s27 }
 0x375   : > { %p1639_p1 = scmp.lt.u32.totalorder %s1637_s4, %s1633_s10  ;;  %p1641_p0 = scmp.lt.u32.totalorder %s1633_s10, %s2215_s9 }
 0x376   : > { %p1635_p4 = pnand %p1634_p8, %p2319_p9 }
 0x377   : > { %p1640_p12 = por %p1639_p1, %p1638_p3 }
 0x378   : > { %p1636_p6 = pneg %p1635_p4 }
 0x379   : > { %p1642_p5 = por %p1641_p0, %p1640_p12 }
 0x37b   : > { %p1643_p7 = pnand %p1642_p5, %p1636_p6 }
 0x37d   : > { %1646 = shalt.err (!%p1643_p7)
}
 0x37e   : > { %1178 = dma.vmem_to_hbm [thread:$0]  (%p2319_p9), %s842_s26, 64, %s2215_s9, %s2157_s0  }
 0x37f PF: > { %s853_s14 = sand.u32 1, %s1701_s17   ;;  %p2322_p10 = scmp.ne.s32.totalorder %s2304_s20, 0 }
 0x380   : > { %p2323_p13 = scmp.ge.s32.totalorder %s1721_s22, 2  ;;  %s854_s2 = scalar_lea.sflag [#allocation4], %s853_s14 }
 0x382   : > { %p1212_p11 = pnand %p2323_p13, %p2322_p10 }
 0x384   : > { %1692 = dma.done.wait (!%p1212_p11), %s854_s2, 64  }
 0x385   : > { %1694 = vsyncadd (!%p1212_p11), %s854_s2, 4294967232  ;;  %s2324_s30 = sadd.s32 4294967294, %s1721_s22  }
 0x386   : > { %s862_s25 = sand.u32 1, %s2324_s30  }
 0x387   : > { %s863_s16 = scalar_lea.sflag [#allocation19], %s862_s25 }
 0x388   : > { %1696 = dma.done.wait (!%p1212_p11), %s863_s16, 128  }
 0x389   : > { %1698 = vsyncadd (!%p1212_p11), %s863_s16, 4294967168  ;;  %s35_s22 = sadd.s32 1, %s1721_s22   ;;  %s2325_s17 = smov %s1705_s18 }
 0x38a   : > { %p32_p9 = scmp.ge.s32.totalorder %s35_s22, 4   ;;  %s2326_s18 = smov %s1709_s19 }
 0x38b   : > { %s2327_s19 = smov %s2047_s12  ;;  %s2328_s20 = smov %s1717_s21 }
 0x38c   : > { %s2329_s21 = smov %s2331_s1  ;;  %34 = sbr.rel (!%p32_p9) target bundleno = 21 (0x15), region = 165 }
 0x393   :  { %877 = vsyncpa [#allocation3], 1 }
 0x394   :  { %879 = vsyncpa [#allocation3 + $0x1], 1 }
 0x395   :  { %880 = vsyncpa [#allocation6], 1 }
 0x396   :  { %881 = vsyncpa [#allocation9], 1 }
 0x397   :  { %882 = vsyncpa [#allocation12], 1 }
 0x398   :  { %883 = vsyncpa [#allocation15], 1 }
 0x399   :  { %884 = vsyncpa [#allocation4], 1 }
 0x39a   :  { %886 = vsyncpa [#allocation4 + $0x1], 1 }
 0x39b   :  { %887 = vsyncpa [#allocation19], 1 }
 0x39c   :  { %889 = vsyncpa [#allocation19 + $0x1], 1 }

</bundles_post_ra>
